<compile_context>
chip_gen: v7x
topology: tpu7x:2x2x1
jax: 0.10.0
libtpu: 0.0.40
codegen_flags: <defaults>
</compile_context>

<pallas_src>
import jax
import jax.numpy as jnp
from jax import lax
from jax.experimental import pallas as pl
from jax.experimental.pallas import tpu as pltpu


def critic_kernel(state_ref, action_ref,
                  w1_ref, b1_ref,
                  w2s_ref, w2a_ref, b2_ref,
                  w3_ref, b3_ref,
                  out_ref):
    f32 = jnp.float32

    # fcs1 + relu  (MXU pass, f32 accumulate; bias/ReLU in f32 on the VPU)
    xs = jnp.dot(state_ref[...], w1_ref[...], preferred_element_type=f32)
    xs = jnp.maximum(xs + b1_ref[...], 0.0)

    # fc2 on concat([xs, action]) == xs @ W2s + action @ W2a
    h = jnp.dot(xs.astype(w2s_ref.dtype), w2s_ref[...], preferred_element_type=f32)
    act = action_ref[...]
    w2a = w2a_ref[...]
    action_size = act.shape[1]
    if action_size <= 8:
        # tiny-K branch: unrolled broadcast-FMAs on the VPU (no 2nd padded MXU pass)
        for j in range(action_size):
            h = h + act[:, j:j + 1] * w2a[j:j + 1, :]
    else:
        h = h + jnp.dot(act, w2a, preferred_element_type=f32)
    h = jnp.maximum(h + b2_ref[...], 0.0)

    # fc3 computed transposed: (agent_count, fc2) . (TILE_B, fc2)^T -> (agent_count, TILE_B)
    # Batch ends up on the lane axis -> lane-dense output store.
    q_t = lax.dot_general(w3_ref[...], h, (((1,), (1,)), ((), ())),
                          preferred_element_type=f32)
    out_ref[...] = q_t + b3_ref[...]


def prepare_critic_params(params, compute_dtype=jnp.float32):
    """One-time layout prep (do NOT redo per forward): transpose PyTorch-style
    (out, in) weights to (in, out), split W2 for the concat, reshape biases.
    `compute_dtype=jnp.bfloat16` feeds bf16 operands to the MXU (v6e/v7x)."""
    w1, b1, w2, b2, w3, b3 = (params[k] for k in ("w1", "b1", "w2", "b2", "w3", "b3"))
    fc1_units = w1.shape[0]
    return {
        "w1_t": w1.T.astype(compute_dtype),                  # (state_size, fc1)
        "b1_r": b1.reshape(1, -1).astype(jnp.float32),       # (1, fc1)
        "w2s_t": w2[:, :fc1_units].T.astype(compute_dtype),  # (fc1, fc2)
        "w2a_t": w2[:, fc1_units:].T.astype(jnp.float32),    # (action_size, fc2) VPU path
        "b2_r": b2.reshape(1, -1).astype(jnp.float32),       # (1, fc2)
        "w3": w3.astype(jnp.float32),                        # (agent_count, fc2)
        "b3_c": b3.reshape(-1, 1).astype(jnp.float32),       # (agent_count, 1)
    }


def critic_forward(state, action, prepped, *, tile_b=512):
    """state: [B, state_size], action: [B, action_size] -> [B, agent_count]"""
    assert tile_b % 128 == 0, "tile_b must be a multiple of 128"
    B, state_size = state.shape
    action_size = action.shape[1]
    fc1_units = prepped["w1_t"].shape[1]
    fc2_units = prepped["w2s_t"].shape[1]
    agent_count = prepped["w3"].shape[0]
    compute_dtype = prepped["w1_t"].dtype

    # Batch tiling: one tile (rounded up to a sublane multiple of 8) for small
    # batches, otherwise tile_b-row tiles (multiple of 128 keeps the lane-dense
    # output block legal when the grid has >1 step).
    b8 = ((B + 7) // 8) * 8
    tb = b8 if b8 <= tile_b else tile_b
    b_pad = ((B + tb - 1) // tb) * tb
    n_tiles = b_pad // tb

    if b_pad != B:
        pad = ((0, b_pad - B), (0, 0))
        state = jnp.pad(state, pad)
        action = jnp.pad(action, pad)
    state = state.astype(compute_dtype)
    action = action.astype(jnp.float32)

    weights = (prepped["w1_t"], prepped["b1_r"], prepped["w2s_t"],
               prepped["w2a_t"], prepped["b2_r"], prepped["w3"], prepped["b3_c"])

    flops = 2 * b_pad * (state_size * fc1_units
                         + (fc1_units + action_size) * fc2_units
                         + fc2_units * agent_count)
    bytes_accessed = int(
        state.size * state.dtype.itemsize
        + action.size * action.dtype.itemsize
        + sum(int(w.size) * w.dtype.itemsize for w in weights)
        + agent_count * b_pad * 4)

    def batch_spec(ncols):
        return pl.BlockSpec((tb, ncols), lambda i: (i, 0))

    def resident_spec(arr):  # full array, DMA'd once, stays in VMEM for every tile
        return pl.BlockSpec(arr.shape, lambda i: (0, 0))

    out_t = pl.pallas_call(
        critic_kernel,
        out_shape=jax.ShapeDtypeStruct((agent_count, b_pad), jnp.float32),
        grid=(n_tiles,),
        in_specs=[batch_spec(state_size), batch_spec(action_size)]
                 + [resident_spec(w) for w in weights],
        out_specs=pl.BlockSpec((agent_count, tb), lambda i: (0, i)),
        compiler_params=pltpu.CompilerParams(dimension_semantics=("parallel",)),
        cost_estimate=pl.CostEstimate(flops=flops, transcendentals=0,
                                      bytes_accessed=bytes_accessed),
    )(state, action, *weights)

    # back to the PyTorch layout [B, agent_count]
    return out_t.T[:B]


def init_critic_params(key, state_size, action_size, agent_count, fc1_units, fc2_units):
    """Deterministic init mirroring Critic.reset_parameters / nn.Linear defaults."""
    ks = jax.random.split(key, 6)
    # hidden_init uses weight.size()[0] == out_features as "fan_in" (quirk preserved).
    lim1 = 1.0 / jnp.sqrt(jnp.float32(fc1_units))
    lim2 = 1.0 / jnp.sqrt(jnp.float32(fc2_units))
    w1 = jax.random.uniform(ks[0], (fc1_units, state_size), jnp.float32, -lim1, lim1)
    w2 = jax.random.uniform(ks[1], (fc2_units, fc1_units + action_size), jnp.float32, -lim2, lim2)
    w3 = jax.random.uniform(ks[2], (agent_count, fc2_units), jnp.float32, -3e-3, 3e-3)
    bl1 = 1.0 / jnp.sqrt(jnp.float32(state_size))
    bl2 = 1.0 / jnp.sqrt(jnp.float32(fc1_units + action_size))
    bl3 = 1.0 / jnp.sqrt(jnp.float32(fc2_units))
    b1 = jax.random.uniform(ks[3], (fc1_units,), jnp.float32, -bl1, bl1)
    b2 = jax.random.uniform(ks[4], (fc2_units,), jnp.float32, -bl2, bl2)
    b3 = jax.random.uniform(ks[5], (agent_count,), jnp.float32, -bl3, bl3)
    return {"w1": w1, "b1": b1, "w2": w2, "b2": b2, "w3": w3, "b3": b3}


def critic_reference(state, action, p):
    xs = jnp.maximum(state @ p["w1"].T + p["b1"], 0.0)
    x = jnp.concatenate([xs, action], axis=1)
    h = jnp.maximum(x @ p["w2"].T + p["b2"], 0.0)
    return h @ p["w3"].T + p["b3"]


if __name__ == "__main__":
    B = 8
    state_size = 24
    action_size = 4
    agent_count = 1
    fc1_units = 64
    fc2_units = 32

    key = jax.random.PRNGKey(0)
    k_state, k_action, k_params = jax.random.split(key, 3)
    state = jax.random.normal(k_state, (B, state_size), jnp.float32)
    action = jax.random.normal(k_action, (B, action_size), jnp.float32)
    params = init_critic_params(k_params, state_size, action_size,
                                agent_count, fc1_units, fc2_units)
    ref = critic_reference(state, action, params)

    # f32 everywhere (v5e-safe) -- strict check, single-tile grid
    prepped_f32 = prepare_critic_params(params)
    out = jax.block_until_ready(critic_forward(state, action, prepped_f32))
    assert out.shape == (B, agent_count)
    assert jnp.allclose(out, ref, atol=1e-5, rtol=1e-5), "f32 kernel mismatch vs reference"

    # multi-tile grid + ragged batch (exercises pipelining / padding / lane-dense path)
    Bx = 600
    kx1, kx2 = jax.random.split(jax.random.PRNGKey(1))
    state_x = jax.random.normal(kx1, (Bx, state_size), jnp.float32)
    action_x = jax.random.normal(kx2, (Bx, action_size), jnp.float32)
    out_x = jax.block_until_ready(critic_forward(state_x, action_x, prepped_f32, tile_b=256))
    ref_x = critic_reference(state_x, action_x, params)
    assert out_x.shape == (Bx, agent_count)
    assert jnp.allclose(out_x, ref_x, atol=1e-4, rtol=1e-4), "tiled kernel mismatch vs reference"

    # NOTE: prepare_critic_params(params, compute_dtype=jnp.bfloat16) feeds bf16 MXU
    # operands (v6e/v7x) with f32 accumulate; not exercised here to keep the run lean.

    print("KERNEL_OK")
</pallas_src>

<mosaic_0001>
module attributes {stable_mosaic.version = 11 : i64} {
  func.func @critic_kernel(%arg0: i32, %arg1: memref<8x24xf32, #tpu.memory_space<vmem>>, %arg2: memref<8x4xf32, #tpu.memory_space<vmem>>, %arg3: memref<24x64xf32, #tpu.memory_space<vmem>>, %arg4: memref<1x64xf32, #tpu.memory_space<vmem>>, %arg5: memref<64x32xf32, #tpu.memory_space<vmem>>, %arg6: memref<4x32xf32, #tpu.memory_space<vmem>>, %arg7: memref<1x32xf32, #tpu.memory_space<vmem>>, %arg8: memref<1x32xf32, #tpu.memory_space<vmem>>, %arg9: memref<1x1xf32, #tpu.memory_space<vmem>>, %arg10: memref<1x8xf32, #tpu.memory_space<vmem>>) attributes {dimension_semantics = [#tpu.dimension_semantics<parallel>], iteration_bounds = array<i64: 1>, scalar_prefetch = 0 : i64, scratch_operands = 0 : i64, tpu.core_type = #tpu.core_type<tc>, window_params = [{transform_indices = @transform_0, window_bounds = array<i64: 8, 24>}, {transform_indices = @transform_1, window_bounds = array<i64: 8, 4>}, {pipeline_mode = #tpu.pipeline_mode<synchronous>, transform_indices = @transform_2, window_bounds = array<i64: 24, 64>}, {pipeline_mode = #tpu.pipeline_mode<synchronous>, transform_indices = @transform_3, window_bounds = array<i64: 1, 64>}, {pipeline_mode = #tpu.pipeline_mode<synchronous>, transform_indices = @transform_4, window_bounds = array<i64: 64, 32>}, {pipeline_mode = #tpu.pipeline_mode<synchronous>, transform_indices = @transform_5, window_bounds = array<i64: 4, 32>}, {pipeline_mode = #tpu.pipeline_mode<synchronous>, transform_indices = @transform_6, window_bounds = array<i64: 1, 32>}, {pipeline_mode = #tpu.pipeline_mode<synchronous>, transform_indices = @transform_7, window_bounds = array<i64: 1, 32>}, {pipeline_mode = #tpu.pipeline_mode<synchronous>, transform_indices = @transform_8, window_bounds = array<i64: 1, 1>}, {transform_indices = @transform_9, window_bounds = array<i64: 1, 8>}]} {
    %c0 = arith.constant 0 : index
    %c0_0 = arith.constant 0 : index
    %0 = vector.load %arg1[%c0, %c0_0] : memref<8x24xf32, #tpu.memory_space<vmem>>, vector<8x24xf32>
    %c0_1 = arith.constant 0 : index
    %c0_2 = arith.constant 0 : index
    %1 = vector.load %arg3[%c0_1, %c0_2] : memref<24x64xf32, #tpu.memory_space<vmem>>, vector<24x64xf32>
    %cst = arith.constant dense<0.000000e+00> : vector<8x64xf32>
    %2 = tpu.matmul %0, %1, %cst {dimension_numbers = #tpu.dot_dimension_numbers<[1], [0], [0], [1], [0, 0, 1, 1], [], []>} : vector<8x24xf32>, vector<24x64xf32>, vector<8x64xf32> -> vector<8x64xf32>
    %c0_3 = arith.constant 0 : index
    %c0_4 = arith.constant 0 : index
    %3 = vector.load %arg4[%c0_3, %c0_4] : memref<1x64xf32, #tpu.memory_space<vmem>>, vector<1x64xf32>
    %4 = vector.broadcast %3 : vector<1x64xf32> to vector<8x64xf32>
    %5 = arith.addf %2, %4 : vector<8x64xf32>
    %cst_5 = arith.constant 0.000000e+00 : f32
    %6 = vector.broadcast %cst_5 : f32 to vector<8x64xf32>
    %7 = arith.maximumf %5, %6 : vector<8x64xf32>
    %c0_6 = arith.constant 0 : index
    %c0_7 = arith.constant 0 : index
    %8 = vector.load %arg5[%c0_6, %c0_7] : memref<64x32xf32, #tpu.memory_space<vmem>>, vector<64x32xf32>
    %cst_8 = arith.constant dense<0.000000e+00> : vector<8x32xf32>
    %9 = tpu.matmul %7, %8, %cst_8 {dimension_numbers = #tpu.dot_dimension_numbers<[1], [0], [0], [1], [0, 0, 1, 1], [], []>} : vector<8x64xf32>, vector<64x32xf32>, vector<8x32xf32> -> vector<8x32xf32>
    %c0_9 = arith.constant 0 : index
    %c0_10 = arith.constant 0 : index
    %10 = vector.load %arg2[%c0_9, %c0_10] : memref<8x4xf32, #tpu.memory_space<vmem>>, vector<8x4xf32>
    %c0_11 = arith.constant 0 : index
    %c0_12 = arith.constant 0 : index
    %11 = vector.load %arg6[%c0_11, %c0_12] : memref<4x32xf32, #tpu.memory_space<vmem>>, vector<4x32xf32>
    %12 = vector.extract_strided_slice %10 {offsets = [0, 0], sizes = [8, 1], strides = [1, 1]} : vector<8x4xf32> to vector<8x1xf32>
    %13 = vector.extract_strided_slice %11 {offsets = [0, 0], sizes = [1, 32], strides = [1, 1]} : vector<4x32xf32> to vector<1x32xf32>
    %14 = vector.broadcast %12 : vector<8x1xf32> to vector<8x32xf32>
    %15 = vector.broadcast %13 : vector<1x32xf32> to vector<8x32xf32>
    %16 = arith.mulf %14, %15 : vector<8x32xf32>
    %17 = arith.addf %9, %16 : vector<8x32xf32>
    %18 = vector.extract_strided_slice %10 {offsets = [0, 1], sizes = [8, 1], strides = [1, 1]} : vector<8x4xf32> to vector<8x1xf32>
    %19 = vector.extract_strided_slice %11 {offsets = [1, 0], sizes = [1, 32], strides = [1, 1]} : vector<4x32xf32> to vector<1x32xf32>
    %20 = vector.broadcast %18 : vector<8x1xf32> to vector<8x32xf32>
    %21 = vector.broadcast %19 : vector<1x32xf32> to vector<8x32xf32>
    %22 = arith.mulf %20, %21 : vector<8x32xf32>
    %23 = arith.addf %17, %22 : vector<8x32xf32>
    %24 = vector.extract_strided_slice %10 {offsets = [0, 2], sizes = [8, 1], strides = [1, 1]} : vector<8x4xf32> to vector<8x1xf32>
    %25 = vector.extract_strided_slice %11 {offsets = [2, 0], sizes = [1, 32], strides = [1, 1]} : vector<4x32xf32> to vector<1x32xf32>
    %26 = vector.broadcast %24 : vector<8x1xf32> to vector<8x32xf32>
    %27 = vector.broadcast %25 : vector<1x32xf32> to vector<8x32xf32>
    %28 = arith.mulf %26, %27 : vector<8x32xf32>
    %29 = arith.addf %23, %28 : vector<8x32xf32>
    %30 = vector.extract_strided_slice %10 {offsets = [0, 3], sizes = [8, 1], strides = [1, 1]} : vector<8x4xf32> to vector<8x1xf32>
    %31 = vector.extract_strided_slice %11 {offsets = [3, 0], sizes = [1, 32], strides = [1, 1]} : vector<4x32xf32> to vector<1x32xf32>
    %32 = vector.broadcast %30 : vector<8x1xf32> to vector<8x32xf32>
    %33 = vector.broadcast %31 : vector<1x32xf32> to vector<8x32xf32>
    %34 = arith.mulf %32, %33 : vector<8x32xf32>
    %35 = arith.addf %29, %34 : vector<8x32xf32>
    %c0_13 = arith.constant 0 : index
    %c0_14 = arith.constant 0 : index
    %36 = vector.load %arg7[%c0_13, %c0_14] : memref<1x32xf32, #tpu.memory_space<vmem>>, vector<1x32xf32>
    %37 = vector.broadcast %36 : vector<1x32xf32> to vector<8x32xf32>
    %38 = arith.addf %35, %37 : vector<8x32xf32>
    %cst_15 = arith.constant 0.000000e+00 : f32
    %39 = vector.broadcast %cst_15 : f32 to vector<8x32xf32>
    %40 = arith.maximumf %38, %39 : vector<8x32xf32>
    %c0_16 = arith.constant 0 : index
    %c0_17 = arith.constant 0 : index
    %41 = vector.load %arg8[%c0_16, %c0_17] : memref<1x32xf32, #tpu.memory_space<vmem>>, vector<1x32xf32>
    %cst_18 = arith.constant dense<0.000000e+00> : vector<1x8xf32>
    %42 = tpu.matmul %41, %40, %cst_18 {dimension_numbers = #tpu.dot_dimension_numbers<[1], [1], [0], [0], [0, 0, 1, 0], [], []>} : vector<1x32xf32>, vector<8x32xf32>, vector<1x8xf32> -> vector<1x8xf32>
    %c0_19 = arith.constant 0 : index
    %c0_20 = arith.constant 0 : index
    %43 = vector.load %arg9[%c0_19, %c0_20] : memref<1x1xf32, #tpu.memory_space<vmem>>, vector<1x1xf32>
    %44 = vector.broadcast %43 : vector<1x1xf32> to vector<1x8xf32>
    %45 = arith.addf %42, %44 : vector<1x8xf32>
    %c0_21 = arith.constant 0 : index
    %c0_22 = arith.constant 0 : index
    %46 = vector.load %arg10[%c0_21, %c0_22] : memref<1x8xf32, #tpu.memory_space<vmem>>, vector<1x8xf32>
    tpu.vector_store %arg10[%c0_21, %c0_22], %45 {strides = array<i32>} : memref<1x8xf32, #tpu.memory_space<vmem>>, vector<1x8xf32>,
    return
  }
  func.func @transform_0(%arg0: i32) -> (i32, i32) {
    %c0_i32 = arith.constant 0 : i32
    %c0_i32_0 = arith.constant 0 : i32
    return %arg0, %c0_i32 : i32, i32
  }
  func.func @transform_1(%arg0: i32) -> (i32, i32) {
    %c0_i32 = arith.constant 0 : i32
    %c0_i32_0 = arith.constant 0 : i32
    return %arg0, %c0_i32 : i32, i32
  }
  func.func @transform_2(%arg0: i32) -> (i32, i32) {
    %c0_i32 = arith.constant 0 : i32
    %c0_i32_0 = arith.constant 0 : i32
    %c0_i32_1 = arith.constant 0 : i32
    return %c0_i32, %c0_i32_0 : i32, i32
  }
  func.func @transform_3(%arg0: i32) -> (i32, i32) {
    %c0_i32 = arith.constant 0 : i32
    %c0_i32_0 = arith.constant 0 : i32
    %c0_i32_1 = arith.constant 0 : i32
    return %c0_i32, %c0_i32_0 : i32, i32
  }
  func.func @transform_4(%arg0: i32) -> (i32, i32) {
    %c0_i32 = arith.constant 0 : i32
    %c0_i32_0 = arith.constant 0 : i32
    %c0_i32_1 = arith.constant 0 : i32
    return %c0_i32, %c0_i32_0 : i32, i32
  }
  func.func @transform_5(%arg0: i32) -> (i32, i32) {
    %c0_i32 = arith.constant 0 : i32
    %c0_i32_0 = arith.constant 0 : i32
    %c0_i32_1 = arith.constant 0 : i32
    return %c0_i32, %c0_i32_0 : i32, i32
  }
  func.func @transform_6(%arg0: i32) -> (i32, i32) {
    %c0_i32 = arith.constant 0 : i32
    %c0_i32_0 = arith.constant 0 : i32
    %c0_i32_1 = arith.constant 0 : i32
    return %c0_i32, %c0_i32_0 : i32, i32
  }
  func.func @transform_7(%arg0: i32) -> (i32, i32) {
    %c0_i32 = arith.constant 0 : i32
    %c0_i32_0 = arith.constant 0 : i32
    %c0_i32_1 = arith.constant 0 : i32
    return %c0_i32, %c0_i32_0 : i32, i32
  }
  func.func @transform_8(%arg0: i32) -> (i32, i32) {
    %c0_i32 = arith.constant 0 : i32
    %c0_i32_0 = arith.constant 0 : i32
    %c0_i32_1 = arith.constant 0 : i32
    return %c0_i32, %c0_i32_0 : i32, i32
  }
  func.func @transform_9(%arg0: i32) -> (i32, i32) {
    %c0_i32 = arith.constant 0 : i32
    %c0_i32_0 = arith.constant 0 : i32
    return %c0_i32, %arg0 : i32, i32
  }
}

</mosaic_0001>

<bundles_post_ra>
// kernel: tpu_custom_call.1
= control target key start
LH: loop header
LB: loop body
LE: loop exit
PB: predicated region body
PF: predicated region fallthrough
CT: control target
= control target key end

     0   :  { %s592_s0 = inlined_call_operand.vmem [shape: f32[8,24], index: 0, kind: input, shape index: {}]   ;;  %s593_s1 = inlined_call_operand.vmem [shape: f32[8,4], index: 1, kind: input, shape index: {}]   ;;  %s594_s2 = inlined_call_operand.vmem [shape: f32[24,64], index: 2, kind: input, shape index: {}]   ;;  %s595_s3 = inlined_call_operand.vmem [shape: f32[1,64], index: 3, kind: input, shape index: {}]   ;;  %s596_s4 = inlined_call_operand.vmem [shape: f32[64,32], index: 4, kind: input, shape index: {}]   ;;  %s597_s5 = inlined_call_operand.vmem [shape: f32[4,32], index: 5, kind: input, shape index: {}]   ;;  %s598_s6 = inlined_call_operand.vmem [shape: f32[1,32], index: 6, kind: input, shape index: {}]   ;;  %s599_s7 = inlined_call_operand.vmem [shape: f32[1,32], index: 7, kind: input, shape index: {}]   ;;  %s600_s8 = inlined_call_operand.<no memory space> [shape: f32[1,1], index: 8, kind: input, shape index: {}]   ;;  %s601_s9 = inlined_call_operand.hbm [shape: f32[1,8], index: 9, kind: output, shape index: {}]  }
   0x1   :  { %v14_v0 = vstv %s600_s8 }
   0x2   :  { %15 = vst [vmem:[#allocation2] sm:$0x1] %v14_v0 }
   0x3   :  { %v36_v1 = vld [vmem:[%s594_s2] sm:$0xff]  ;;  %v37_v2 = vld [vmem:[%s594_s2 + $0x8] sm:$0xff]  ;;  %v465_v3 = vmov 0.0|0.0   ;;  %vm466_vm0 = vmmov 0   ;;  %v467_v5 = vmov 0.0   ;;  %v123_v9 = vld [vmem:[%s596_s4 + $0x10] sm:$0xff] }
   0x4   :  { %412 = vmatprep.subr.bf16.mxu0 %v465_v3  ;;  %v413_v4 = vpack.c.bf16 %v37_v2, %v36_v1  ;;  %385 = vmatprep.mubr.msk.f32.mxu0 %vm466_vm0, %v467_v5  ;;  %v121_v6 = vld [vmem:[%s596_s4] sm:$0xff]  ;;  %v122_v7 = vld [vmem:[%s596_s4 + $0x8] sm:$0xff]  ;;  %v124_v10 = vld [vmem:[%s596_s4 + $0x18] sm:$0xff] }
   0x5   :  { %415 = vmatprep.subr.bf16.mxu1 %v465_v3  ;;  %v416_v8 = vpack.c.bf16 %v122_v7, %v121_v6  ;;  %404 = vmatprep.mubr.msk.f32.mxu1 %vm466_vm0, %v467_v5 }
   0x6   :  { %414 = vmatpush3.bf16.msra.mxu0 %v413_v4 }
   0x7   :  { %16 = vsyncpa [#allocation4], 0  ;;  %383 = vmatprep.subr.mxu0 %v467_v5  ;;  %v38_v11 = vld [vmem:[%s594_s2 + $0x10] sm:$0xff]  ;;  %417 = vmatpush3.bf16.msra.mxu1 %v416_v8  ;;  %v419_v12 = vpack.c.bf16 %v124_v10, %v123_v9  ;;  %v35_v13 = vld [vmem:[%s592_s0] sm:$0xff]  ;;  %vm46_vm1 = vcmask 195584   ;;  %v468_v21 = vmov 0   ;;  %v136_v31 = vlaneseq }
   0x8   :  { %418 = vmatprep.subr.bf16.mxu1 %v465_v3  ;;  %v125_v14 = vld [vmem:[%s596_s4 + $0x20] sm:$0xff]  ;;  %v126_v15 = vld [vmem:[%s596_s4 + $0x28] sm:$0xff]  ;;  %v127_v17 = vld [vmem:[%s596_s4 + $0x30] sm:$0xff]  ;;  %435 = vset.pattern.permute.xlu0 %v468_v21  ;;  %v469_v22 = vmov 2   ;;  %v470_v23 = vmov 1   ;;  %v471_v24 = vmov 3  }
   0x9   :  { %v422_v16 = vpack.c.bf16 %v126_v15, %v125_v14  ;;  %v128_v18 = vld [vmem:[%s596_s4 + $0x38] sm:$0xff]  ;;  %v129_v20 = vld [vmem:[%s593_s1] sm:$0xff]  ;;  %437 = vset.pattern.permute.xlu1 %v469_v22  ;;  %vm141_vm2 = vcmask 523264   ;;  %v137_v32 = vshrl.u32 %v136_v31, 7  ;;  %vm265_vm3 = vcmask 261120   ;;  %s472_s8 = smov [#allocation3]  }
   0xa   :  { %384 = vmatpush3.msra.mxu0 %v38_v11  ;;  %v425_v19 = vpack.c.bf16 %v128_v18, %v127_v17  ;;  %133 = vperm.xlu0 %435, %v129_v20   ;;  %v358_v25 = vld [vmem:[%s595_s3] ss:$0 sm:$0xff]  ;;  %s350_s17 = sshll.u32 %s472_s8, 4  ;;  %vm342_vm4 = vcmask 57344   ;;  %s351_s17 = int_to_ptr.vmem [resolvable:$true] %s350_s17 }
   0xb   :  { %386 = vmatmul.mubr.msk.f32.vlgmr.msra.gmra.mrb[0].mxu0 %vm46_vm1, %v35_v13  ;;  %420 = vmatpush3.bf16.msra.mxu1 %v419_v12  ;;  %v255_v30 = vld [vmem:[#allocation2] sm:$0x1]  ;;  %v138_v34 = vsub.s32 0, %v137_v32  ;;  %v221_v35 = vsub.s32 1, %v137_v32  ;;  %v231_v39 = vsub.s32 2, %v137_v32  ;;  %v241_v41 = vsub.s32 3, %v137_v32  ;;  %p446_p1 = scmp.lt.s32.totalorder %s351_s17, %s351_s17 }
   0xc   :  { %421 = vmatprep.subr.bf16.mxu1 %v465_v3  ;;  %407 = vmatprep.subr.mxu0 %v467_v5  ;;  %v130_v36 = vld [vmem:[%s597_s5] sm:$0xf]  ;;  %s445_s18 = scalar_lea.vmem %s351_s17, 32 }
   0xd   :  { %409 = vmatprep.mubr.msk.f32.mxu0 %vm466_vm0, %v467_v5  ;;  %226 = vperm.xlu1 %437, %v129_v20   ;;  %v139_v38 = vrot.slane %v130_v36, %v138_v34  ;;  %v222_v40 = vrot.slane %v130_v36, %v221_v35  ;;  %v232_v44 = vrot.slane %v130_v36, %v231_v39  ;;  %v361_v55 = vld [vmem:[%s598_s6] ss:$0 sm:$0xff]  ;;  %s441_s6 = scalar_lea.vmem %s351_s17, 16 }
   0xe   :  { %436 = vset.pattern.permute.xlu0 %v470_v23  ;;  %v242_v46 = vrot.slane %v130_v36, %v241_v41  ;;  %v254_v59 = vld [vmem:[%s599_s7] sm:$0x1]  ;;  %p442_p0 = scmp.ne.s32.totalorder %s351_s17, %s441_s6  ;;  %p447_p2 = scmp.lt.s32.totalorder %s445_s18, %s441_s6 }
   0xf   :  { %423 = vmatpush3.bf16.msra.mxu1 %v422_v16  ;;  %216 = vperm.xlu0 %436, %v129_v20  }
  0x10   :  { %424 = vmatprep.subr.bf16.mxu1 %v465_v3  ;;  %p448_p3 = por %p447_p2, %p446_p1 }
  0x11   :  { %438 = vset.pattern.permute.xlu1 %v471_v24 }
  0x12   :  { %236 = vperm.xlu1 %438, %v129_v20   ;;  %p449_p4 = pnand %p448_p3, %p442_p0 }
  0x13   :  { %426 = vmatpush3.bf16.msra.mxu1 %v425_v19  ;;  %440 = vset.pattern.permute.xlu0 %v468_v21 }
  0x16   :  { %439 = vset.pattern.permute.xlu1 %v468_v21 }
  0x17   :  { %258 = vperm.xlu1 %439, %v255_v30  }
  0x89   :  { %v134_v33 = vpop.permute.xlu0 %133 }
  0x8a   :  { %v140_v43 = vmul.f32 %v139_v38, %v134_v33 }
  0x8c   :  { %v227_v37 = vpop.permute.xlu1 %226 }
  0x8d   :  { %v233_v51 = vmul.f32 %v232_v44, %v227_v37 }
  0x8e   :  { %v217_v42 = vpop.permute.xlu0 %216 }
  0x8f   :  { %v223_v45 = vmul.f32 %v222_v40, %v217_v42 }
  0x91   :  { %v237_v48 = vpop.permute.xlu1 %236 }
  0x92   :  { %v243_v53 = vmul.f32 %v242_v46, %v237_v48 }
  0x96   :  { %v259_v60 = vpop.permute.xlu1 %258 }
  0x97   :  { %v264_v61 = vrot.slane %v259_v60, %v138_v34 }
  0xde   :  { %v116_v26 = vpop.f32.mrb[0].mxu0 }
  0xdf   :  { %v117_v27 = vadd.f32 %v358_v25, %v116_v26  ;;  %v387_v28 = vpop.f32.mrb[1].mxu0 }
  0xe1   :  { %v120_v29 = vmax.f32 %v117_v27, 0.0 }
  0xe3   :  { %405 = vmatmul.mubr.msk.f32.vlgmr.msra.gmra.mrb[0].mxu1 %vm141_vm2, %v120_v29 }
 0x1b6   :  { %v211_v47 = vpop.f32.mrb[0].mxu1 }
 0x1b7   :  { %v212_v49 = vadd.f32 %v211_v47, %v140_v43  ;;  %v406_v50 = vpop.f32.mrb[1].mxu1 }
 0x1b9   :  { %v224_v52 = vadd.f32 %v223_v45, %v212_v49 }
 0x1bb   :  { %v234_v54 = vadd.f32 %v233_v51, %v224_v52 }
 0x1bd   :  { %v244_v56 = vadd.f32 %v243_v53, %v234_v54 }
 0x1bf   :  { %v252_v57 = vadd.f32 %v361_v55, %v244_v56 }
 0x1c1   :  { %v253_v58 = vmax.f32 %v252_v57, 0.0 }
 0x1c3   :  { %408 = vmatpush3.xpose.msk.msra.mxu0 %vm265_vm3, %v253_v58 }
 0x1c6   :  { %410 = vmatmul.mubr.msk.f32.vlgmr.msra.gmra.mrb[2].mxu0 %vm265_vm3, %v254_v59 }
 0x299   :  { %v338_v62 = vpop.f32.mrb[2].mxu0 }
 0x29a   :  { %v339_v63 = vadd.f32 %v338_v62, %v264_v61  ;;  %v411_v0 = vpop.f32.mrb[3].mxu0 }
 0x29c   :  { %343 = vst.msk [vmem:[#allocation3] sm:$0x1] %vm342_vm4, %v339_v63 }
 0x29d   :  { %452 = shalt.err (!%p449_p4)
}
 0x29e   :  { %s453_s20 = scalar_lea.hbm %s601_s9, 16 }
 0x29f   :  { %p454_p5 = scmp.ne.s32.totalorder %s601_s9, %s453_s20  ;;  %p457_p6 = scmp.lt.u32.totalorder %s453_s20, %s601_s9 }
 0x2a1   :  { %p459_p7 = pnand %p457_p6, %p454_p5 }
 0x2a3   :  { %462 = shalt.err (!%p459_p7)
}
 0x2a4   :  { %353 = dma.vmem_to_hbm [thread:$0]  %s351_s17, 16, %s601_s9, [#allocation4]  }
 0x2a5   :  { %463 = dma.done.wait [#allocation4], 16  }
 0x2a6   :  { %464 = vsyncadd [#allocation4], 4294967280 }
 0x2a7   :  { %357 = vsyncpa [#allocation4], 1 }

</bundles_post_ra>
